<compile_context>
chip_gen: v7x
topology: tpu7x:2x2x1
jax: 0.10.0
libtpu: 0.0.40
codegen_flags: <defaults>
</compile_context>

<pallas_src>
import functools

import jax
import jax.numpy as jnp
from jax import lax
from jax.experimental import pallas as pl
from jax.experimental.pallas import tpu as pltpu


def _round_up(n, m):
    return (n + m - 1) // m * m


def _masked_layernorm(x, w, b, d_real, eps=1e-5):
    """LayerNorm over the last dim of f32 `x` whose first `d_real` columns are
    real data and whose remaining (padded) columns are zero."""
    d_pad = x.shape[-1]
    inv_d = 1.0 / d_real
    mu = jnp.sum(x, axis=-1, keepdims=True) * inv_d
    diff = x - mu
    if d_real != d_pad:
        col = lax.broadcasted_iota(jnp.int32, (1, d_pad), 1) < d_real
        diff = jnp.where(col, diff, 0.0)
    var = jnp.sum(diff * diff, axis=-1, keepdims=True) * inv_d
    return diff * lax.rsqrt(var + eps) * w + b


# --------------------------- Kernel A: LN1 + K/V ---------------------------
def _ln_kv_kernel(x_ref, ln1w_ref, ln1b_ref, wk_ref, wv_ref, k_ref, v_ref,
                  *, d_model):
    x = x_ref[0].astype(jnp.float32)
    xn = _masked_layernorm(x, ln1w_ref[...], ln1b_ref[...], d_model)
    xn = xn.astype(jnp.bfloat16)
    k_ref[0] = jnp.dot(xn, wk_ref[...],
                       preferred_element_type=jnp.float32).astype(jnp.bfloat16)
    v_ref[0] = jnp.dot(xn, wv_ref[...],
                       preferred_element_type=jnp.float32).astype(jnp.bfloat16)


# ---------------- Kernel B: Q + flash attention + FF + residuals -----------
def _attn_ff_kernel(xq_ref, k_ref, v_ref,
                    ln1w_ref, ln1b_ref, wq_ref, wo_ref, bo_ref,
                    ln3w_ref, ln3b_ref, wg_ref, bg_ref, w2_ref, b2_ref,
                    o_ref,
                    q_buf, m_scr, l_scr, acc_scr,
                    *, n_heads, d_head, d_model, seq_len, seq_pad,
                    d_ff_pad, ff_chunk):
    f32 = jnp.float32
    bf16 = jnp.bfloat16
    ki = pl.program_id(2)
    nk = pl.num_programs(2)
    tkv = k_ref.shape[1]

    # -------- query-tile setup: run once per (batch, q-tile) --------
    @pl.when(ki == 0)
    def _init():
        x = xq_ref[0].astype(f32)
        xn = _masked_layernorm(x, ln1w_ref[...], ln1b_ref[...], d_model)
        # 1/sqrt(d_head) already folded into wq by the wrapper.
        q_buf[...] = jnp.dot(xn.astype(bf16), wq_ref[...],
                             preferred_element_type=f32).astype(bf16)
        m_scr[...] = jnp.full_like(m_scr, -1e30)
        l_scr[...] = jnp.zeros_like(l_scr)
        acc_scr[...] = jnp.zeros_like(acc_scr)

    # -------- online-softmax update with this K/V tile --------
    if seq_pad != seq_len:
        kv_pos = ki * tkv + lax.broadcasted_iota(jnp.int32, (1, tkv), 1)
        kv_valid = kv_pos < seq_len
    for h in range(n_heads):
        hs = slice(h * d_head, (h + 1) * d_head)
        qh = q_buf[:, hs]                          # (tq, d_head)  bf16
        kh = k_ref[0, :, hs]                       # (tkv, d_head) bf16
        vh = v_ref[0, :, hs]                       # (tkv, d_head) bf16
        s = lax.dot_general(qh, kh, (((1,), (1,)), ((), ())),
                            preferred_element_type=f32)        # (tq, tkv)
        if seq_pad != seq_len:
            s = jnp.where(kv_valid, s, -1e30)      # mask padded KV rows
        m_prev = m_scr[h]                                        # (tq, 1)
        m_new = jnp.maximum(m_prev, jnp.max(s, axis=-1, keepdims=True))
        alpha = jnp.exp(m_prev - m_new)
        p = jnp.exp(s - m_new)
        l_scr[h] = alpha * l_scr[h] + jnp.sum(p, axis=-1, keepdims=True)
        m_scr[h] = m_new
        pv = jnp.dot(p.astype(bf16), vh, preferred_element_type=f32)
        acc_scr[:, hs] = alpha * acc_scr[:, hs] + pv

    # -------- finalize: out-proj + residual + LN3 + GeGLU FF + residual ----
    @pl.when(ki == nk - 1)
    def _finalize():
        # Approx reciprocal -> rows do not sum to exactly 1 (documented).
        for h in range(n_heads):
            hs = slice(h * d_head, (h + 1) * d_head)
            acc_scr[:, hs] = acc_scr[:, hs] * pl.reciprocal(l_scr[h],
                                                            approx=True)
        attn = jnp.dot(acc_scr[...].astype(bf16), wo_ref[...],
                       preferred_element_type=f32) + bo_ref[...]
        x1 = xq_ref[0].astype(f32) + attn                      # residual 1

        xn2 = _masked_layernorm(x1, ln3w_ref[...], ln3b_ref[...], d_model)
        xn2 = xn2.astype(bf16)

        # GeGLU feed-forward, chunked over d_ff; Wg columns are pre-arranged
        # by the wrapper as [value(0:d_ff_pad) | gate(d_ff_pad:2*d_ff_pad)].
        # Exact (erf) GELU to match torch.nn.functional.gelu defaults.
        ff = jnp.zeros_like(x1)
        for c in range(0, d_ff_pad, ff_chunk):
            val = (jnp.dot(xn2, wg_ref[:, c:c + ff_chunk],
                           preferred_element_type=f32)
                   + bg_ref[:, c:c + ff_chunk])
            gate = (jnp.dot(xn2, wg_ref[:, d_ff_pad + c:d_ff_pad + c + ff_chunk],
                            preferred_element_type=f32)
                    + bg_ref[:, d_ff_pad + c:d_ff_pad + c + ff_chunk])
            hidden = (val * jax.nn.gelu(gate, approximate=False)).astype(bf16)
            ff = ff + jnp.dot(hidden, w2_ref[c:c + ff_chunk, :],
                              preferred_element_type=f32)

        o_ref[0] = (x1 + ff + b2_ref[...]).astype(o_ref.dtype)   # residual 2


# ------------------------------- wrapper -----------------------------------
def basic_transformer_block(x, params, *, n_heads, d_head,
                            s_tile=256, ff_chunk=512):
    """BasicTransformerBlock forward with Pallas TPU kernels.

    x: [B, S, d_model] float32.  Returns float32 [B, S, d_model].
    """
    (ln1w, ln1b, wq, wk, wv, wo, bo, ln3w, ln3b, wg, bg, w2, b2) = params
    B, S, d_model = x.shape
    d_attn = n_heads * d_head
    d_ff = 4 * d_model

    f32, bf16 = jnp.float32, jnp.bfloat16

    # Lane-dense padded sizes (multiples of 128) and sequence tiling.
    dm_p = _round_up(d_model, 128)
    da_p = _round_up(d_attn, 128)
    df_p = _round_up(d_ff, 128)
    ts = min(_round_up(s_tile, 8), _round_up(S, 8))
    s_pad = _round_up(S, ts)
    n_s = s_pad // ts
    cf = min(ff_chunk, df_p)
    if df_p % cf != 0:
        cf = 128

    def pad2(a, r, c):
        return jnp.pad(a, ((0, r - a.shape[0]), (0, c - a.shape[1])))

    def padv(a, n):
        return jnp.pad(a, (0, n - a.shape[0])).reshape(1, n)

    scale = d_head ** -0.5
    ln1w_p = padv(ln1w, dm_p).astype(f32)
    ln1b_p = padv(ln1b, dm_p).astype(f32)
    ln3w_p = padv(ln3w, dm_p).astype(f32)
    ln3b_p = padv(ln3b, dm_p).astype(f32)
    wq_p = pad2(wq * scale, dm_p, da_p).astype(bf16)   # scale folded into Wq
    wk_p = pad2(wk, dm_p, da_p).astype(bf16)
    wv_p = pad2(wv, dm_p, da_p).astype(bf16)
    wo_p = pad2(wo, da_p, dm_p).astype(bf16)
    bo_p = padv(bo, dm_p).astype(f32)
    # GeGLU weight repacked as [value | gate], each half padded to df_p.
    wg_p = jnp.concatenate([pad2(wg[:, :d_ff], dm_p, df_p),
                            pad2(wg[:, d_ff:], dm_p, df_p)],
                           axis=1).astype(bf16)
    bg_p = jnp.concatenate([padv(bg[:d_ff], df_p),
                            padv(bg[d_ff:], df_p)], axis=1).astype(f32)
    w2_p = pad2(w2, df_p, dm_p).astype(bf16)
    b2_p = padv(b2, dm_p).astype(f32)

    # bf16 activation stream at the kernel boundary (residual math stays f32
    # inside the kernels).
    x_p = jnp.pad(x, ((0, 0), (0, s_pad - S),
                      (0, dm_p - d_model))).astype(bf16)

    const_a = lambda b, i: (0, 0)
    const_b = lambda b, q, k: (0, 0)

    # ---- Kernel A: LN1 + K/V projection -----------------------------------
    k_all, v_all = pl.pallas_call(
        functools.partial(_ln_kv_kernel, d_model=d_model),
        out_shape=(jax.ShapeDtypeStruct((B, s_pad, da_p), bf16),
                   jax.ShapeDtypeStruct((B, s_pad, da_p), bf16)),
        grid_spec=pltpu.PrefetchScalarGridSpec(
            num_scalar_prefetch=0,
            grid=(B, n_s),
            in_specs=[
                pl.BlockSpec((1, ts, dm_p), lambda b, i: (b, i, 0)),
                pl.BlockSpec((1, dm_p), const_a),
                pl.BlockSpec((1, dm_p), const_a),
                pl.BlockSpec((dm_p, da_p), const_a),
                pl.BlockSpec((dm_p, da_p), const_a),
            ],
            out_specs=(pl.BlockSpec((1, ts, da_p), lambda b, i: (b, i, 0)),
                       pl.BlockSpec((1, ts, da_p), lambda b, i: (b, i, 0))),
        ),
        compiler_params=pltpu.CompilerParams(
            dimension_semantics=("parallel", "parallel"),
            vmem_limit_bytes=32 * 1024 * 1024),
    )(x_p, ln1w_p, ln1b_p, wk_p, wv_p)

    # ---- Kernel B: Q + flash attention + out-proj + LN3 + GeGLU -----------
    out_p = pl.pallas_call(
        functools.partial(_attn_ff_kernel, n_heads=n_heads, d_head=d_head,
                          d_model=d_model, seq_len=S, seq_pad=s_pad,
                          d_ff_pad=df_p, ff_chunk=cf),
        out_shape=jax.ShapeDtypeStruct((B, s_pad, dm_p), bf16),
        grid_spec=pltpu.PrefetchScalarGridSpec(
            num_scalar_prefetch=0,
            grid=(B, n_s, n_s),
            in_specs=[
                pl.BlockSpec((1, ts, dm_p), lambda b, q, k: (b, q, 0)),  # x
                pl.BlockSpec((1, ts, da_p), lambda b, q, k: (b, k, 0)),  # K
                pl.BlockSpec((1, ts, da_p), lambda b, q, k: (b, k, 0)),  # V
                pl.BlockSpec((1, dm_p), const_b),          # ln1 weight
                pl.BlockSpec((1, dm_p), const_b),          # ln1 bias
                pl.BlockSpec((dm_p, da_p), const_b),       # Wq (scaled)
                pl.BlockSpec((da_p, dm_p), const_b),       # Wo
                pl.BlockSpec((1, dm_p), const_b),          # bo
                pl.BlockSpec((1, dm_p), const_b),          # ln3 weight
                pl.BlockSpec((1, dm_p), const_b),          # ln3 bias
                pl.BlockSpec((dm_p, 2 * df_p), const_b),   # Wg [value|gate]
                pl.BlockSpec((1, 2 * df_p), const_b),      # bg
                pl.BlockSpec((df_p, dm_p), const_b),       # W2
                pl.BlockSpec((1, dm_p), const_b),          # b2
            ],
            out_specs=pl.BlockSpec((1, ts, dm_p), lambda b, q, k: (b, q, 0)),
            scratch_shapes=[
                pltpu.VMEM((ts, da_p), bf16),              # Q for this q-tile
                pltpu.VMEM((n_heads, ts, 1), f32),         # online-softmax m
                pltpu.VMEM((n_heads, ts, 1), f32),         # online-softmax l
                pltpu.VMEM((ts, da_p), f32),               # context accum
            ],
        ),
        compiler_params=pltpu.CompilerParams(
            dimension_semantics=("parallel", "parallel", "arbitrary"),
            vmem_limit_bytes=56 * 1024 * 1024),
    )(x_p, k_all, v_all, ln1w_p, ln1b_p, wq_p, wo_p, bo_p,
      ln3w_p, ln3b_p, wg_p, bg_p, w2_p, b2_p)

    return out_p[:, :S, :d_model].astype(f32)


# ------------------------------ reference ----------------------------------
def reference_block(x, params, *, n_heads, d_head):
    """Pure-JAX f32 reference for the correctness check."""
    (ln1w, ln1b, wq, wk, wv, wo, bo, ln3w, ln3b, wg, bg, w2, b2) = params
    B, S, D = x.shape
    d_ff = 4 * D

    def ln(v, w, b):
        mu = jnp.mean(v, axis=-1, keepdims=True)
        var = jnp.mean((v - mu) ** 2, axis=-1, keepdims=True)
        return (v - mu) / jnp.sqrt(var + 1e-5) * w + b

    xn = ln(x, ln1w, ln1b)
    q = (xn @ wq).reshape(B, S, n_heads, d_head)
    k = (xn @ wk).reshape(B, S, n_heads, d_head)
    v = (xn @ wv).reshape(B, S, n_heads, d_head)
    attn = jnp.einsum('bihd,bjhd->bhij', q, k) * (d_head ** -0.5)
    attn = jax.nn.softmax(attn, axis=-1)
    out = jnp.einsum('bhij,bjhd->bihd', attn, v).reshape(B, S, -1)
    x = out @ wo + bo + x

    xn = ln(x, ln3w, ln3b)
    proj = xn @ wg + bg
    hidden = proj[..., :d_ff] * jax.nn.gelu(proj[..., d_ff:],
                                            approximate=False)
    return hidden @ w2 + b2 + x


if __name__ == "__main__":
    # Small shapes consistent with the module's forward.  S=20 with an S-tile
    # of 8 exercises the multi-tile flash-attention streaming path and the
    # padded-KV softmax mask; d_model=32 exercises the 128-lane padding path.
    B, S = 2, 20
    d_model, n_heads, d_head = 32, 4, 8
    d_attn = n_heads * d_head
    d_ff = 4 * d_model

    key = jax.random.PRNGKey(0)
    ks = jax.random.split(key, 10)
    x = jax.random.normal(ks[0], (B, S, d_model), dtype=jnp.float32)

    def init(k, shape, fan_in):
        return jax.random.normal(k, shape, dtype=jnp.float32) / jnp.sqrt(fan_in)

    params = (
        jnp.ones((d_model,), jnp.float32),                    # ln1 weight
        jnp.zeros((d_model,), jnp.float32),                   # ln1 bias
        init(ks[1], (d_model, d_attn), d_model),              # Wq
        init(ks[2], (d_model, d_attn), d_model),              # Wk
        init(ks[3], (d_model, d_attn), d_model),              # Wv
        init(ks[4], (d_attn, d_model), d_attn),               # Wo
        jnp.zeros((d_model,), jnp.float32),                   # bo
        jnp.ones((d_model,), jnp.float32),                    # ln3 weight
        jnp.zeros((d_model,), jnp.float32),                   # ln3 bias
        init(ks[5], (d_model, 2 * d_ff), d_model),            # GeGLU proj W
        init(ks[6], (2 * d_ff,), d_model) * 0.1,              # GeGLU proj b
        init(ks[7], (d_ff, d_model), d_ff),                   # FF out W
        init(ks[8], (d_model,), d_ff) * 0.1,                  # FF out b
    )

    out = basic_transformer_block(x, params, n_heads=n_heads, d_head=d_head,
                                  s_tile=8)
    out = jax.block_until_ready(out)

    ref = reference_block(x, params, n_heads=n_heads, d_head=d_head)
    assert out.shape == (B, S, d_model)

    # bf16 activations/weights + approx softmax reciprocal -> scale-aware
    # tolerance against the f32 reference.
    err = float(jnp.max(jnp.abs(out - ref)))
    tol = 5e-2 * float(jnp.max(jnp.abs(ref))) + 5e-2
    assert err <= tol, f"max abs err {err} > tol {tol}"

    print("KERNEL_OK")
</pallas_src>

<mosaic_0001>
module attributes {stable_mosaic.version = 11 : i64} {
  func.func @_ln_kv_kernel(%arg0: i32, %arg1: i32, %arg2: memref<1x8x128xbf16, #tpu.memory_space<vmem>>, %arg3: memref<1x128xf32, #tpu.memory_space<vmem>>, %arg4: memref<1x128xf32, #tpu.memory_space<vmem>>, %arg5: memref<128x128xbf16, #tpu.memory_space<vmem>>, %arg6: memref<128x128xbf16, #tpu.memory_space<vmem>>, %arg7: memref<1x8x128xbf16, #tpu.memory_space<vmem>>, %arg8: memref<1x8x128xbf16, #tpu.memory_space<vmem>>) attributes {dimension_semantics = [#tpu.dimension_semantics<parallel>, #tpu.dimension_semantics<parallel>], iteration_bounds = array<i64: 2, 3>, scalar_prefetch = 0 : i64, scratch_operands = 0 : i64, tpu.core_type = #tpu.core_type<tc>, window_params = [{transform_indices = @transform_0, window_bounds = array<i64: 1, 8, 128>}, {pipeline_mode = #tpu.pipeline_mode<synchronous>, transform_indices = @transform_1, window_bounds = array<i64: 1, 128>}, {pipeline_mode = #tpu.pipeline_mode<synchronous>, transform_indices = @transform_2, window_bounds = array<i64: 1, 128>}, {pipeline_mode = #tpu.pipeline_mode<synchronous>, transform_indices = @transform_3, window_bounds = array<i64: 128, 128>}, {pipeline_mode = #tpu.pipeline_mode<synchronous>, transform_indices = @transform_4, window_bounds = array<i64: 128, 128>}, {transform_indices = @transform_5, window_bounds = array<i64: 1, 8, 128>}, {transform_indices = @transform_6, window_bounds = array<i64: 1, 8, 128>}]} {
    %c0 = arith.constant 0 : index
    %c0_0 = arith.constant 0 : index
    %c0_1 = arith.constant 0 : index
    %0 = vector.load %arg2[%c0, %c0_0, %c0_1] : memref<1x8x128xbf16, #tpu.memory_space<vmem>>, vector<1x8x128xbf16>
    %1 = vector.shape_cast %0 : vector<1x8x128xbf16> to vector<8x128xbf16>
    %2 = arith.extf %1 : vector<8x128xbf16> to vector<8x128xf32>
    %c0_2 = arith.constant 0 : index
    %c0_3 = arith.constant 0 : index
    %3 = vector.load %arg3[%c0_2, %c0_3] : memref<1x128xf32, #tpu.memory_space<vmem>>, vector<1x128xf32>
    %c0_4 = arith.constant 0 : index
    %c0_5 = arith.constant 0 : index
    %4 = vector.load %arg4[%c0_4, %c0_5] : memref<1x128xf32, #tpu.memory_space<vmem>>, vector<1x128xf32>
    %cst = arith.constant dense<0.000000e+00> : vector<8xf32>
    %5 = vector.multi_reduction <add>, %2, %cst [1] : vector<8x128xf32> to vector<8xf32>
    %6 = vector.shape_cast %5 : vector<8xf32> to vector<8x1xf32>
    %cst_6 = arith.constant 3.125000e-02 : f32
    %7 = vector.broadcast %cst_6 : f32 to vector<8x1xf32>
    %8 = arith.mulf %6, %7 : vector<8x1xf32>
    %9 = vector.broadcast %8 : vector<8x1xf32> to vector<8x128xf32>
    %10 = arith.subf %2, %9 : vector<8x128xf32>
    %11 = tpu.iota {dimensions = array<i32: 1>} : vector<1x128xi32>
    %c32_i32 = arith.constant 32 : i32
    %12 = vector.broadcast %c32_i32 : i32 to vector<1x128xi32>
    %13 = arith.cmpi slt, %11, %12 : vector<1x128xi32>
    %cst_7 = arith.constant 0.000000e+00 : f32
    %14 = vector.shape_cast %13 : vector<1x128xi1> to vector<1x128xi1>
    %15 = vector.broadcast %14 : vector<1x128xi1> to vector<8x128xi1>
    %16 = vector.broadcast %cst_7 : f32 to vector<8x128xf32>
    %17 = arith.select %15, %10, %16 : vector<8x128xi1>, vector<8x128xf32>
    %18 = arith.mulf %17, %17 : vector<8x128xf32>
    %cst_8 = arith.constant dense<0.000000e+00> : vector<8xf32>
    %19 = vector.multi_reduction <add>, %18, %cst_8 [1] : vector<8x128xf32> to vector<8xf32>
    %20 = vector.shape_cast %19 : vector<8xf32> to vector<8x1xf32>
    %cst_9 = arith.constant 3.125000e-02 : f32
    %21 = vector.broadcast %cst_9 : f32 to vector<8x1xf32>
    %22 = arith.mulf %20, %21 : vector<8x1xf32>
    %cst_10 = arith.constant 9.99999974E-6 : f32
    %23 = vector.broadcast %cst_10 : f32 to vector<8x1xf32>
    %24 = arith.addf %22, %23 : vector<8x1xf32>
    %25 = math.rsqrt %24 : vector<8x1xf32>
    %26 = vector.broadcast %25 : vector<8x1xf32> to vector<8x128xf32>
    %27 = arith.mulf %17, %26 : vector<8x128xf32>
    %28 = vector.broadcast %3 : vector<1x128xf32> to vector<8x128xf32>
    %29 = arith.mulf %27, %28 : vector<8x128xf32>
    %30 = vector.broadcast %4 : vector<1x128xf32> to vector<8x128xf32>
    %31 = arith.addf %29, %30 : vector<8x128xf32>
    %32 = arith.truncf %31 : vector<8x128xf32> to vector<8x128xbf16>
    %c0_11 = arith.constant 0 : index
    %c0_12 = arith.constant 0 : index
    %33 = vector.load %arg5[%c0_11, %c0_12] : memref<128x128xbf16, #tpu.memory_space<vmem>>, vector<128x128xbf16>
    %cst_13 = arith.constant dense<0.000000e+00> : vector<8x128xf32>
    %34 = tpu.matmul %32, %33, %cst_13 {dimension_numbers = #tpu.dot_dimension_numbers<[1], [0], [0], [1], [0, 0, 1, 1], [], []>} : vector<8x128xbf16>, vector<128x128xbf16>, vector<8x128xf32> -> vector<8x128xf32>
    %35 = arith.truncf %34 : vector<8x128xf32> to vector<8x128xbf16>
    %c0_14 = arith.constant 0 : index
    %c0_15 = arith.constant 0 : index
    %c0_16 = arith.constant 0 : index
    %36 = vector.load %arg7[%c0_14, %c0_15, %c0_16] : memref<1x8x128xbf16, #tpu.memory_space<vmem>>, vector<1x8x128xbf16>
    %37 = vector.shape_cast %36 : vector<1x8x128xbf16> to vector<8x128xbf16>
    %38 = vector.shape_cast %35 : vector<8x128xbf16> to vector<1x8x128xbf16>
    tpu.vector_store %arg7[%c0_14, %c0_15, %c0_16], %38 {strides = array<i32>} : memref<1x8x128xbf16, #tpu.memory_space<vmem>>, vector<1x8x128xbf16>,
    %c0_17 = arith.constant 0 : index
    %c0_18 = arith.constant 0 : index
    %39 = vector.load %arg6[%c0_17, %c0_18] : memref<128x128xbf16, #tpu.memory_space<vmem>>, vector<128x128xbf16>
    %cst_19 = arith.constant dense<0.000000e+00> : vector<8x128xf32>
    %40 = tpu.matmul %32, %39, %cst_19 {dimension_numbers = #tpu.dot_dimension_numbers<[1], [0], [0], [1], [0, 0, 1, 1], [], []>} : vector<8x128xbf16>, vector<128x128xbf16>, vector<8x128xf32> -> vector<8x128xf32>
    %41 = arith.truncf %40 : vector<8x128xf32> to vector<8x128xbf16>
    %c0_20 = arith.constant 0 : index
    %c0_21 = arith.constant 0 : index
    %c0_22 = arith.constant 0 : index
    %42 = vector.load %arg8[%c0_20, %c0_21, %c0_22] : memref<1x8x128xbf16, #tpu.memory_space<vmem>>, vector<1x8x128xbf16>
    %43 = vector.shape_cast %42 : vector<1x8x128xbf16> to vector<8x128xbf16>
    %44 = vector.shape_cast %41 : vector<8x128xbf16> to vector<1x8x128xbf16>
    tpu.vector_store %arg8[%c0_20, %c0_21, %c0_22], %44 {strides = array<i32>} : memref<1x8x128xbf16, #tpu.memory_space<vmem>>, vector<1x8x128xbf16>,
    return
  }
  func.func @transform_0(%arg0: i32, %arg1: i32) -> (i32, i32, i32) {
    %c0_i32 = arith.constant 0 : i32
    %c0_i32_0 = arith.constant 0 : i32
    return %arg0, %arg1, %c0_i32 : i32, i32, i32
  }
  func.func @transform_1(%arg0: i32, %arg1: i32) -> (i32, i32) {
    %c0_i32 = arith.constant 0 : i32
    %c0_i32_0 = arith.constant 0 : i32
    %c0_i32_1 = arith.constant 0 : i32
    return %c0_i32, %c0_i32_0 : i32, i32
  }
  func.func @transform_2(%arg0: i32, %arg1: i32) -> (i32, i32) {
    %c0_i32 = arith.constant 0 : i32
    %c0_i32_0 = arith.constant 0 : i32
    %c0_i32_1 = arith.constant 0 : i32
    return %c0_i32, %c0_i32_0 : i32, i32
  }
  func.func @transform_3(%arg0: i32, %arg1: i32) -> (i32, i32) {
    %c0_i32 = arith.constant 0 : i32
    %c0_i32_0 = arith.constant 0 : i32
    %c0_i32_1 = arith.constant 0 : i32
    return %c0_i32, %c0_i32_0 : i32, i32
  }
  func.func @transform_4(%arg0: i32, %arg1: i32) -> (i32, i32) {
    %c0_i32 = arith.constant 0 : i32
    %c0_i32_0 = arith.constant 0 : i32
    %c0_i32_1 = arith.constant 0 : i32
    return %c0_i32, %c0_i32_0 : i32, i32
  }
  func.func @transform_5(%arg0: i32, %arg1: i32) -> (i32, i32, i32) {
    %c0_i32 = arith.constant 0 : i32
    %c0_i32_0 = arith.constant 0 : i32
    return %arg0, %arg1, %c0_i32 : i32, i32, i32
  }
  func.func @transform_6(%arg0: i32, %arg1: i32) -> (i32, i32, i32) {
    %c0_i32 = arith.constant 0 : i32
    %c0_i32_0 = arith.constant 0 : i32
    return %arg0, %arg1, %c0_i32 : i32, i32, i32
  }
}

</mosaic_0001>

<bundles_post_ra>
// kernel: tpu_custom_call.1
= control target key start
LH: loop header
LB: loop body
LE: loop exit
PB: predicated region body
PF: predicated region fallthrough
CT: control target
= control target key end

     0   :  { %s1552_s0 = inlined_call_operand.hbm [shape: bf16[2,24,128], index: 0, kind: input, shape index: {}]   ;;  %s1553_s1 = inlined_call_operand.vmem [shape: f32[1,128], index: 1, kind: input, shape index: {}]   ;;  %s1554_s2 = inlined_call_operand.vmem [shape: f32[1,128], index: 2, kind: input, shape index: {}]   ;;  %s1555_s3 = inlined_call_operand.hbm [shape: bf16[128,128], index: 3, kind: input, shape index: {}]   ;;  %s1556_s4 = inlined_call_operand.hbm [shape: bf16[128,128], index: 4, kind: input, shape index: {}]   ;;  %s1557_s5 = inlined_call_operand.hbm [shape: bf16[2,24,128], index: 5, kind: output, shape index: {0}]   ;;  %s1558_s6 = inlined_call_operand.hbm [shape: bf16[2,24,128], index: 6, kind: output, shape index: {1}]  }
   0x1   :  { %1569 = sst [smem:[#allocation19_spill]] %s1555_s3 }
   0x2   :  { %1570 = sst [smem:[#allocation20_spill]] %s1556_s4 }
   0x3   :  { %1571 = sst [smem:[#allocation21_spill]] %s1558_s6 }
   0x4   :  { %12 = vsyncpa [#allocation3], 0 }
   0x5   :  { %14 = vsyncpa [#allocation3 + $0x1], 0 }
   0x6   :  { %15 = vsyncpa [#allocation6], 0 }
   0x7   :  { %16 = vsyncpa [#allocation4], 0 }
   0x8   :  { %18 = vsyncpa [#allocation4 + $0x1], 0 }
   0x9   :  { %19 = vsyncpa [#allocation10], 0 }
   0xa   :  { %21 = vsyncpa [#allocation10 + $0x1], 0  ;;  %s1241_s21 = smov 0   ;;  %s1243_s22 = smov 0  }
   0xb   :  { %s1245_s23 = smov 0   ;;  %s1247_s24 = smov 0  }
   0xc   :  { %s1249_s25 = smov 0   ;;  %s1251_s26 = smov 0  }
   0xd   :  { %s1253_s27 = smov 0   ;;  %s1255_s28 = smov 0  }
   0xe LB: > { %1572 = sst [smem:[#allocation15_spill]] %s1167_s21  ;;  %s750_s29 = sadd.s32 4294967295, %s1195_s28   ;;  %s1195_s28 = sphi %s1255_s28, %s27_s28   ;;  %s1191_s27 = sphi %s1253_s27, %s1603_s27   ;;  %s1187_s26 = sphi %s1251_s26, %s1602_s26   ;;  %s1183_s25 = sphi %s1249_s25, %s1601_s25   ;;  %s1179_s24 = sphi %s1247_s24, %s1600_s24   ;;  %s1175_s23 = sphi %s1245_s23, %s1599_s23   ;;  %s1171_s22 = sphi %s1243_s22, %s1598_s22   ;;  %s1167_s21 = sphi %s1241_s21, %s1597_s21  }
   0xf   : > { %s751_s30 = sadd.s32 4294967294, %s1195_s28   ;;  %p61_p0 = scmp.ne.s32.totalorder %s1171_s22, %s1167_s21 }
  0x10   : > { %p1285_p1 = scmp.eq.s32.totalorder %s750_s29, 0  ;;  %p1289_p2 = scmp.eq.s32.totalorder %s750_s29, 5 }
  0x11   : > { %p177_p3 = scmp.eq.s32.totalorder %s751_s30, 5  ;;  %p752_p5 = scmp.ge.s32.totalorder %s1195_s28, 1 }
  0x12   : > { %s1573_s7 = scalar_select %p1285_p1, 1, 0 }
  0x13   : > { %s1574_s8 = scalar_select %p1289_p2, 1, 0 }
  0x14   : > { %p1295_p4 = por %p1285_p1, %p61_p0  ;;  %p1300_p6 = por %p177_p3, %p61_p0 }
  0x15   : > { %p212_p7 = scmp.lt.s32.totalorder %s1195_s28, 7  ;;  %s1197_s12 = smov [#allocation5]  }
  0x16   : > { %s1575_s9 = scalar_select %p1295_p4, 1, 0 }
  0x17   : > { %s1576_s10 = scalar_select %p1300_p6, 1, 0 }
  0x18   : > { %p1305_p8 = pnand %p752_p5, %p212_p7  ;;  %s230_s13 = sshll.u32 %s1197_s12, 4  ;;  %s231_s13 = int_to_ptr.vmem [resolvable:$true] %s230_s13 }
  0x19   : > { %1577 = sst [smem:[#allocation16_spill]] %s1576_s10  ;;  %s1198_s15 = smov [#allocation7]  }
  0x1a   : > { %s1578_s11 = scalar_select %p1305_p8, 1, 0 }
  0x1b   : > { %p863_p9 = pneg %p1305_p8  ;;  %s243_s16 = sshll.u32 %s1198_s15, 4  ;;  %s1317_s16 = int_to_ptr.vmem [resolvable:$true] %s243_s16 }
  0x1c   : > { %s1580_s3 = sld [smem:[#allocation19_spill]] }
  0x1d   : > { %p1313_p10 = pnand %p863_p9, %p1285_p1 }
  0x1f   : > { %p977_p12 = pneg %p1313_p10 }
  0x22   : > { %s975_s19 = scalar_lea.hbm %s1580_s3, 1024 }
  0x23   : > { %p976_p11 = scmp.ne.s32.totalorder %s1580_s3, %s975_s19  ;;  %p982_p3 = scmp.lt.u32.totalorder %s975_s19, %s1580_s3 }
  0x25   : > { %p978_p13 = pnand %p977_p12, %p976_p11 }
  0x27   : > { %p979_p0 = pneg %p978_p13 }
  0x29   : > { %p984_p5 = pnand %p982_p3, %p979_p0 }
  0x2b   : > { %987 = shalt.err (!%p984_p5)
}
  0x2c   : > { %s988_s15 = scalar_lea.vmem %s231_s13, 1024  ;;  %p996_p1 = scmp.lt.s32.totalorder %s231_s13, %s231_s13 }
  0x2d   : > { %p989_p7 = scmp.ne.s32.totalorder %s231_s13, %s988_s15  ;;  %p997_p4 = scmp.lt.s32.totalorder %s988_s15, %s988_s15 }
  0x2f   : > { %p991_p9 = pnand %p989_p7, %p977_p12  ;;  %p998_p8 = por %p997_p4, %p996_p1 }
  0x31   : > { %p992_p6 = pneg %p991_p9 }
  0x33   : > { %p999_p2 = pnand %p998_p8, %p992_p6 }
  0x35   : > { %1002 = shalt.err (!%p999_p2)
}
  0x36   : > { %s1199_s17 = smov 64   ;;  %s1200_s18 = smov 4  }
  0x37   : > { %866 = dma.hbm_to_vmem [thread:$0]  (!%p1313_p10), %s1580_s3, 1024, %s231_s13, [#allocation6], %s1199_s17, %s1199_s17, %s1200_s18  }
  0x38   : > { %s1581_s4 = sld [smem:[#allocation20_spill]] }
  0x3e   : > { %s1003_s12 = scalar_lea.hbm %s1581_s4, 1024 }
  0x3f   : > { %p1004_p11 = scmp.ne.s32.totalorder %s1581_s4, %s1003_s12  ;;  %p1010_p4 = scmp.lt.u32.totalorder %s1003_s12, %s1581_s4 }
  0x41   : > { %p1006_p1 = pnand %p1004_p11, %p977_p12 }
  0x43   : > { %p1007_p2 = pneg %p1006_p1 }
  0x45   : > { %p1012_p6 = pnand %p1010_p4, %p1007_p2 }
  0x47   : > { %1015 = shalt.err (!%p1012_p6)
}
  0x48   : > { %s1016_s13 = scalar_lea.vmem %s1317_s16, 1024  ;;  %p1024_p3 = scmp.lt.s32.totalorder %s1317_s16, %s1317_s16 }
  0x49   : > { %p1017_p8 = scmp.ne.s32.totalorder %s1317_s16, %s1016_s13  ;;  %p1025_p5 = scmp.lt.s32.totalorder %s1016_s13, %s1016_s13 }
  0x4b   : > { %p1019_p13 = pnand %p1017_p8, %p977_p12  ;;  %p1026_p7 = por %p1025_p5, %p1024_p3 }
  0x4d   : > { %p1020_p0 = pneg %p1019_p13 }
  0x4f   : > { %p1027_p9 = pnand %p1026_p7, %p1020_p0 }
  0x51   : > { %1030 = shalt.err (!%p1027_p9)
}
  0x52   : > { %869 = dma.hbm_to_vmem [thread:$0]  (!%p1313_p10), %s1581_s4, 1024, %s1317_s16, [#allocation6], %s1199_s17, %s1199_s17, %s1200_s18  }
  0x53   : > { %s36_s10 = sadd.s32 1, %s1187_s26  ;;  %s39_s19 = sadd.s32 1, %s1191_s27 }
  0x54   : > { %p37_p12 = scmp.ge.s32.totalorder %s36_s10, 3  ;;  %s48_s14 = sadd.s32 1, %s1175_s23 }
  0x55   : > { %p55_p11 = scmp.ne.s32.totalorder %s1175_s23, %s1171_s22  ;;  %p56_p1 = scmp.eq.s32.totalorder %s1195_s28, 0 }
  0x56   : > { %s1605_s10 = smov (%p37_p12, %s36_s10), 0  ;;  %s1607_s19 = smov (!%p37_p12, %s39_s19), %s1191_s27 }
  0x57   : > { %1582 = sst [smem:[#allocation17_spill]] %s1605_s10  ;;  %s44_s20 = ssub.s32 %s1187_s26, %s1605_s10 }
  0x58   : > { %p1377_p2 = por %p56_p1, %p55_p11  ;;  %p41_p10 = scmp.ge.s32.totalorder %s1607_s19, 2 }
  0x59   : > { %p1584_p4 = scmp.ne.s32.totalorder %s1574_s8, 0  ;;  %p883_p8 = scmp.lt.s32.totalorder %s1195_s28, 6 }
  0x5a   : > { %s257_s17 = sand.u32 1, %s1175_s23   ;;  %s1609_s19 = smov (%p41_p10, %s1607_s19), 0 }
  0x5b   : > { %p1383_p6 = por %p1584_p4, %p55_p11  ;;  %s756_s18 = sshll.u32 %s257_s17, 2 }
  0x5c   : > { %s43_s30 = ssub.s32 %s1191_s27, %s1609_s19  ;;  %s846_s15 = smul.u32 3, %s1191_s27 }
  0x5d   : > { %s1585_s16 = scalar_select %p1383_p6, 1, 0 }
  0x5e   : > { %s45_s12 = sor.u32 %s44_s20, %s43_s30  ;;  %s261_s13 = scalar_lea.vmem [#allocation2], %s756_s18 }
  0x5f   : > { %1586 = sst [smem:[#allocation18_spill]] %s1585_s16  ;;  %p46_p13 = scmp.eq.s32.totalorder %s45_s12, 0 }
  0x60   : > { %s270_s6 = sshll.u32 %s261_s13, 4  ;;  %s266_s21 = sadd.s32 %s1187_s26, %s846_s15  ;;  %s1395_s6 = int_to_ptr.vmem [resolvable:$true] %s270_s6 }
  0x61   : > { %s1398_s8 = scalar_select %p46_p13, %s1175_s23, %s48_s14  }
  0x62   : > { %s757_s3 = sshll.u32 %s266_s21, 6  ;;  %p1404_p0 = pnand %p883_p8, %p1377_p2 }
  0x63   : > { %s1411_s20 = scalar_lea.hbm %s1552_s0, %s757_s3  ;;  %s258_s14 = scalar_lea.sflag [#allocation3], %s257_s17 }
  0x64   : > { %s1031_s18 = scalar_lea.hbm %s1411_s20, 64  ;;  %p1033_p5 = pneg %p1404_p0 }
  0x65   : > { %p1032_p3 = scmp.ne.s32.totalorder %s1411_s20, %s1031_s18  ;;  %s1036_s10 = scalar_lea.hbm %s1552_s0, 384 }
  0x66   : > { %p1037_p12 = scmp.lt.u32.totalorder %s1411_s20, %s1552_s0  ;;  %p1038_p11 = scmp.lt.u32.totalorder %s1036_s10, %s1031_s18 }
  0x67   : > { %p1034_p7 = pnand %p1033_p5, %p1032_p3  ;;  %p1040_p2 = scmp.lt.u32.totalorder %s1031_s18, %s1411_s20 }
  0x68   : > { %p1039_p1 = por %p1038_p11, %p1037_p12 }
  0x69   : > { %p1035_p9 = pneg %p1034_p7 }
  0x6a   : > { %p1041_p10 = por %p1040_p2, %p1039_p1 }
  0x6c   : > { %p1042_p4 = pnand %p1041_p10, %p1035_p9 }
  0x6e   : > { %1045 = shalt.err (!%p1042_p4)
}
  0x6f   : > { %s1046_s17 = scalar_lea.vmem %s1395_s6, 64  ;;  %s1201_s12 = smov [#allocation2]  }
  0x70   : > { %p1047_p8 = scmp.ne.s32.totalorder %s1395_s6, %s1046_s17  ;;  %s1051_s15 = sshll.u32 %s1201_s12, 4  ;;  %s1052_s15 = int_to_ptr.vmem [resolvable:$false] %s1051_s15 }
  0x71   : > { %s1053_s13 = scalar_lea.vmem %s1052_s15, 128  ;;  %p1054_p7 = scmp.lt.s32.totalorder %s1395_s6, %s1052_s15 }
  0x72   : > { %p1049_p13 = pnand %p1047_p8, %p1033_p5  ;;  %p1055_p12 = scmp.lt.s32.totalorder %s1053_s13, %s1046_s17 }
  0x74   : > { %p1050_p3 = pneg %p1049_p13  ;;  %p1056_p11 = por %p1055_p12, %p1054_p7 }
  0x76   : > { %p1057_p1 = pnand %p1056_p11, %p1050_p3 }
  0x78   : > { %1060 = shalt.err (!%p1057_p1)
}
  0x79   : > { %873 = dma.hbm_to_vmem [thread:$0]  (!%p1404_p0), %s1411_s20, 64, %s1395_s6, %s258_s14  }
  0x7a   : > { %p1588_p9 = scmp.ne.s32.totalorder %s1578_s11, 0 }
  0x7b   : > { %s1441_s21 = sand.u32 (!%p1588_p9), 1, %s1171_s22   ;;  %p1589_p5 = scmp.ne.s32.totalorder (!%p1588_p9), %s1575_s9, 0 }
  0x7c   : > { %279 = sbr.rel (%p1588_p9) target bundleno = 703 (0x2bf), region = 40  ;;  %s1444_s18 = sshll.u32 (!%p1588_p9), %s1441_s21, 2 }
  0x7d   : > { %s282_s29 = scalar_lea.sflag (!%p1588_p9), [#allocation3], %s1441_s21  ;;  %s285_s30 = scalar_lea.vmem (!%p1588_p9), [#allocation2], %s1444_s18 }
  0x83   : > { %1150 = dma.done.wait (%p1589_p5), %s282_s29, 64  }
  0x84   : > { %1152 = vsyncadd (%p1589_p5), %s282_s29, 4294967232  ;;  %p1590_p0 = scmp.ne.s32.totalorder %s1573_s7, 0 }
  0x86   : > { %1154 = dma.done.wait (%p1590_p0), [#allocation6], 2048  }
  0x87   : > { %1156 = vsyncadd (%p1590_p0), [#allocation6], 4294965248  ;;  %v328_v0 = vld [vmem:[%s285_s30] sm:$0xf]  ;;  %v957_v2 = vld [vmem:[#allocation5] sm:$0xff]   ;;  %v1202_v4 = vmov 0.0   ;;  %v336_v7 = vlaneseq }
  0x88   : > { %v329_v1 = vunpack.c.l.bf16 %v328_v0  ;;  %v958_v3 = vld [vmem:[#allocation7] sm:$0xff]   ;;  %806 = vmatprep.subr.bf16.mxu0 %v1202_v4  ;;  %826 = vmatprep.subr.bf16.mxu1 %v1202_v4  ;;  %v959_v5 = vld [vmem:[#allocation5 + $0x8] sm:$0xff]   ;;  %v961_v14 = vld [vmem:[#allocation5 + $0x10] sm:$0xff]   ;;  %vm1203_vm1 = vmmov 0   ;;  %s847_s6 = smul.u32 3, %s1183_s25  ;;  %s319_s10 = scalar_lea.vmem [#allocation8], %s1444_s18 }
  0x89   : > { %807 = vmatpush3.bf16.msra.mxu0 %v957_v2  ;;  %827 = vmatpush3.bf16.msra.mxu1 %v958_v3  ;;  %v960_v6 = vld [vmem:[#allocation7 + $0x8] sm:$0xff]   ;;  %v337_v8 = vand.u32 127, %v336_v7  ;;  %v962_v15 = vld [vmem:[#allocation7 + $0x10] sm:$0xff]   ;;  %v963_v16 = vld [vmem:[#allocation5 + $0x18] sm:$0xff]   ;;  %s597_s16 = sshll.u32 %s319_s10, 4  ;;  %s326_s3 = scalar_lea.vmem [#allocation9], %s1444_s18  ;;  %s1471_s16 = int_to_ptr.vmem [resolvable:$true] %s597_s16 }
  0x8a   : > { %332 = vadd.xlane.f32.xlu0 %v329_v1  ;;  %808 = vmatprep.subr.bf16.mxu0 %v1202_v4  ;;  %v964_v17 = vld [vmem:[#allocation7 + $0x18] sm:$0xff]   ;;  %v965_v18 = vld [vmem:[#allocation5 + $0x20] sm:$0xff]   ;;  %v967_v20 = vld [vmem:[#allocation5 + $0x28] sm:$0xff]   ;;  %s593_s20 = sadd.s32 %s1179_s24, %s847_s6  ;;  %s612_s17 = sshll.u32 %s326_s3, 4  ;;  %s1478_s17 = int_to_ptr.vmem [resolvable:$true] %s612_s17 }
  0x8b   : > { %828 = vmatprep.subr.bf16.mxu1 %v1202_v4  ;;  %vm338_vm0 = vcmp.lt.s32.totalorder %v337_v8, 32  ;;  %v966_v19 = vld [vmem:[#allocation7 + $0x20] sm:$0xff]   ;;  %822 = vmatprep.mubr.msk.bf16.mxu0 %vm1203_vm1, %v1202_v4  ;;  %v968_v21 = vld [vmem:[#allocation7 + $0x28] sm:$0xff]   ;;  %v969_v22 = vld [vmem:[#allocation5 + $0x30] sm:$0xff]   ;;  %s784_s14 = sshll.u32 %s593_s20, 6  ;;  %s1592_s18 = sld [smem:[#allocation21_spill]] }
  0x8c   : > { %842 = vmatprep.mubr.msk.bf16.mxu1 %vm1203_vm1, %v1202_v4  ;;  %v970_v23 = vld [vmem:[#allocation7 + $0x30] sm:$0xff]   ;;  %v971_v24 = vld [vmem:[#allocation5 + $0x38] sm:$0xff]   ;;  %s1469_s13 = scalar_lea.hbm %s1557_s5, %s784_s14  ;;  %s577_s4 = scalar_lea.sflag [#allocation4], %s1441_s21 }
  0x8d   : > { %809 = vmatpush3.bf16.msra.mxu0 %v959_v5  ;;  %829 = vmatpush3.bf16.msra.mxu1 %v960_v6  ;;  %v972_v25 = vld [vmem:[#allocation7 + $0x38] sm:$0xff]   ;;  %s1061_s7 = scalar_lea.vmem %s1471_s16, 64  ;;  %s1204_s9 = smov [#allocation8]  }
  0x8e   : > { %810 = vmatprep.subr.bf16.mxu0 %v1202_v4  ;;  %830 = vmatprep.subr.bf16.mxu1 %v1202_v4  ;;  %v764_v30 = vld [vmem:[%s1553_s1] ss:$0 sm:$0xff]  ;;  %p1062_p2 = scmp.ne.s32.totalorder %s1471_s16, %s1061_s7  ;;  %s1065_s11 = sshll.u32 %s1204_s9, 4  ;;  %s1066_s11 = int_to_ptr.vmem [resolvable:$false] %s1065_s11 }
  0x8f   : > { %v765_v32 = vld [vmem:[%s1554_s2] ss:$0 sm:$0xff]  ;;  %s1067_s6 = scalar_lea.vmem %s1066_s11, 128  ;;  %p1068_p8 = scmp.lt.s32.totalorder %s1471_s16, %s1066_s11 }
  0x90   : > { %p1063_p10 = pnand %p1062_p2, %p1383_p6  ;;  %p1069_p13 = scmp.lt.s32.totalorder %s1067_s6, %s1061_s7 }
  0x91   : > { %811 = vmatpush3.bf16.msra.mxu0 %v961_v14  ;;  %831 = vmatpush3.bf16.msra.mxu1 %v962_v15  ;;  %s1476_s30 = scalar_lea.hbm %s1592_s18, %s784_s14 }
  0x92   : > { %812 = vmatprep.subr.bf16.mxu0 %v1202_v4  ;;  %832 = vmatprep.subr.bf16.mxu1 %v1202_v4  ;;  %p1064_p4 = pneg %p1063_p10  ;;  %p1070_p3 = por %p1069_p13, %p1068_p8 }
  0x94   : > { %p1071_p7 = pnand %p1070_p3, %p1064_p4 }
  0x95   : > { %813 = vmatpush3.bf16.msra.mxu0 %v963_v16  ;;  %833 = vmatpush3.bf16.msra.mxu1 %v964_v17 }
  0x96   : > { %814 = vmatprep.subr.bf16.mxu0 %v1202_v4  ;;  %834 = vmatprep.subr.bf16.mxu1 %v1202_v4 }
  0x99   : > { %815 = vmatpush3.bf16.msra.mxu0 %v965_v18  ;;  %835 = vmatpush3.bf16.msra.mxu1 %v966_v19 }
  0x9a   : > { %816 = vmatprep.subr.bf16.mxu0 %v1202_v4  ;;  %836 = vmatprep.subr.bf16.mxu1 %v1202_v4 }
  0x9d   : > { %817 = vmatpush3.bf16.msra.mxu0 %v967_v20  ;;  %837 = vmatpush3.bf16.msra.mxu1 %v968_v21 }
  0x9e   : > { %818 = vmatprep.subr.bf16.mxu0 %v1202_v4  ;;  %838 = vmatprep.subr.bf16.mxu1 %v1202_v4 }
  0xa1   : > { %819 = vmatpush3.bf16.msra.mxu0 %v969_v22  ;;  %839 = vmatpush3.bf16.msra.mxu1 %v970_v23 }
  0xa2   : > { %820 = vmatprep.subr.bf16.mxu0 %v1202_v4  ;;  %840 = vmatprep.subr.bf16.mxu1 %v1202_v4 }
  0xa5   : > { %821 = vmatpush3.bf16.msra.mxu0 %v971_v24  ;;  %841 = vmatpush3.bf16.msra.mxu1 %v972_v25 }
 0x117   : > { %v333_v9 = vpop.xlane.xlu0 %332 }
 0x118   : > { %v334_v10 = vmul.f32 0.03125, %v333_v9 }
 0x11a   : > { %v335_v11 = vsub.f32 %v329_v1, %v334_v10 }
 0x11c   : > { %v341_v12 = vsel %vm338_vm0, %v335_v11, 0.0 }
 0x11d   : > { %v342_v13 = vmul.f32 %v341_v12, %v341_v12 }
 0x11f   : > { %343 = vadd.xlane.f32.xlu0 %v342_v13 }
 0x1ac   : > { %v344_v26 = vpop.xlane.xlu0 %343 }
 0x1ad   : > { %v345_v27 = vmul.f32 0.03125, %v344_v26 }
 0x1af   : > { %v346_v28 = vadd.f32 1e-05, %v345_v27 }
 0x1b1   : > { %973 = vrsqrt.f32 %v346_v28 }
 0x1bb   : > { %v974_v29 = vpop.eup %973 }
 0x1bc   : > { %v348_v31 = vmul.f32 %v974_v29, %v341_v12 }
 0x1be   : > { %v355_v33 = vmul.f32 %v764_v30, %v348_v31 }
 0x1c0   : > { %v362_v34 = vadd.f32 %v765_v32, %v355_v33 }
 0x1c2   : > { %v363_v35 = vpack.c.bf16 %v362_v34, %v362_v34 }
 0x1c4   : > { %823 = vmatmul.mubr.bf16.vlgmr.msra.gmra.mrb[0].mxu0 %v363_v35  ;;  %843 = vmatmul.mubr.bf16.vlgmr.msra.gmra.mrb[0].mxu1 %v363_v35 }
 0x297   : > { %v462_v36 = vpop.f32.mrb[0].mxu0  ;;  %v568_v37 = vpop.f32.mrb[0].mxu1 }
 0x298   : > { %v468_v38 = vpack.c.bf16 %v462_v36, %v462_v36  ;;  %v574_v39 = vpack.c.bf16 %v568_v37, %v568_v37  ;;  %v824_v40 = vpop.f32.mrb[1].mxu0  ;;  %v844_v41 = vpop.f32.mrb[1].mxu1 }
 0x299   : > { %v465_v42 = vpop.f32.mrb[2].mxu0  ;;  %v571_v43 = vpop.f32.mrb[2].mxu1 }
 0x29a   : > { %469 = vst [vmem:[%s319_s10] sm:$0xf] %v468_v38  ;;  %575 = vst [vmem:[%s326_s3] sm:$0xf] %v574_v39  ;;  %v825_v44 = vpop.f32.mrb[3].mxu0  ;;  %v845_v45 = vpop.f32.mrb[3].mxu1 }
 0x29b   : > { %1074 = shalt.err (!%p1071_p7)
}
 0x29c   : > { %s1075_s20 = scalar_lea.hbm %s1469_s13, 64  ;;  %s1079_s3 = scalar_lea.hbm %s1557_s5, 384 }
 0x29d   : > { %p1076_p12 = scmp.ne.s32.totalorder %s1469_s13, %s1075_s20  ;;  %p1080_p9 = scmp.lt.u32.totalorder %s1469_s13, %s1557_s5 }
 0x29e   : > { %p1081_p5 = scmp.lt.u32.totalorder %s1079_s3, %s1075_s20  ;;  %p1083_p2 = scmp.lt.u32.totalorder %s1075_s20, %s1469_s13 }
 0x29f   : > { %p1077_p11 = pnand %p1076_p12, %p1383_p6 }
 0x2a0   : > { %p1082_p0 = por %p1081_p5, %p1080_p9 }
 0x2a1   : > { %p1078_p1 = pneg %p1077_p11 }
 0x2a2   : > { %p1084_p10 = por %p1083_p2, %p1082_p0 }
 0x2a4   : > { %p1085_p4 = pnand %p1084_p10, %p1078_p1 }
 0x2a6   : > { %1088 = shalt.err (!%p1085_p4)
}
 0x2a7   : > { %859 = dma.vmem_to_hbm [thread:$0]  (%p1383_p6), %s1471_s16, 64, %s1469_s13, %s577_s4  }
 0x2a8   : > { %s582_s24 = scalar_lea.sflag [#allocation10], %s1441_s21  ;;  %s1089_s25 = scalar_lea.vmem %s1478_s17, 64 }
 0x2a9   : > { %p1090_p8 = scmp.ne.s32.totalorder %s1478_s17, %s1089_s25  ;;  %s1205_s7 = smov [#allocation9]  }
 0x2aa   : > { %s1093_s9 = sshll.u32 %s1205_s7, 4  ;;  %s1094_s9 = int_to_ptr.vmem [resolvable:$false] %s1093_s9 }
 0x2ab   : > { %p1091_p13 = pnand %p1090_p8, %p1383_p6  ;;  %s1095_s11 = scalar_lea.vmem %s1094_s9, 128 }
 0x2ac   : > { %p1096_p7 = scmp.lt.s32.totalorder %s1478_s17, %s1094_s9  ;;  %p1097_p12 = scmp.lt.s32.totalorder %s1095_s11, %s1089_s25 }
 0x2ad   : > { %p1092_p3 = pneg %p1091_p13 }
 0x2ae   : > { %p1098_p11 = por %p1097_p12, %p1096_p7 }
 0x2b0   : > { %p1099_p1 = pnand %p1098_p11, %p1092_p3 }
 0x2b2   : > { %1102 = shalt.err (!%p1099_p1)
}
 0x2b3   : > { %s1103_s21 = scalar_lea.hbm %s1476_s30, 64  ;;  %s1107_s4 = scalar_lea.hbm %s1592_s18, 384 }
 0x2b4   : > { %p1104_p9 = scmp.ne.s32.totalorder %s1476_s30, %s1103_s21  ;;  %p1108_p2 = scmp.lt.u32.totalorder %s1476_s30, %s1592_s18 }
 0x2b5   : > { %p1109_p10 = scmp.lt.u32.totalorder %s1107_s4, %s1103_s21  ;;  %p1111_p8 = scmp.lt.u32.totalorder %s1103_s21, %s1476_s30 }
 0x2b6   : > { %p1105_p5 = pnand %p1104_p9, %p1383_p6 }
 0x2b7   : > { %p1110_p4 = por %p1109_p10, %p1108_p2 }
 0x2b8   : > { %p1106_p0 = pneg %p1105_p5 }
 0x2b9   : > { %p1112_p13 = por %p1111_p8, %p1110_p4 }
 0x2bb   : > { %p1113_p3 = pnand %p1112_p13, %p1106_p0 }
 0x2bd   : > { %1116 = shalt.err (!%p1113_p3)
}
 0x2be   : > { %860 = dma.vmem_to_hbm [thread:$0]  (%p1383_p6), %s1478_s17, 64, %s1476_s30, %s582_s24  }
 0x2bf PF: > { %s1593_s14 = sld [smem:[#allocation15_spill]]  ;;  %s1594_s10 = sld [smem:[#allocation16_spill]] }
 0x2c0   : > { %p886_p7 = scmp.ge.s32.totalorder %s1195_s28, 2 }
 0x2c5   : > { %s624_s3 = sand.u32 1, %s1593_s14   ;;  %p1595_p12 = scmp.ne.s32.totalorder %s1594_s10, 0 }
 0x2c6   : > { %s625_s12 = scalar_lea.sflag [#allocation4], %s624_s3 }
 0x2c7   : > { %p875_p11 = pnand %p886_p7, %p1595_p12 }
 0x2c9   : > { %1158 = dma.done.wait (!%p875_p11), %s625_s12, 64  }
 0x2ca   : > { %1160 = vsyncadd (!%p875_p11), %s625_s12, 4294967232  ;;  %s634_s15 = scalar_lea.sflag [#allocation10], %s624_s3 }
 0x2cb   : > { %1162 = dma.done.wait (!%p875_p11), %s634_s15, 64  }
 0x2cc   : > { %1164 = vsyncadd (!%p875_p11), %s634_s15, 4294967232  ;;  %s27_s28 = sadd.s32 1, %s1195_s28   ;;  %s1596_s17 = sld [smem:[#allocation17_spill]] }
 0x2cd   : > { %p24_p1 = scmp.ge.s32.totalorder %s27_s28, 8   ;;  %s1597_s21 = smov %s1171_s22 }
 0x2ce   : > { %s1598_s22 = smov %s1175_s23  ;;  %s1599_s23 = smov %s1398_s8 }
 0x2cf   : > { %s1600_s24 = smov %s1187_s26  ;;  %s1601_s25 = smov %s1191_s27 }
 0x2d0   : > { %s1603_s27 = smov %s1609_s19  ;;  %26 = sbr.rel (!%p24_p1) target bundleno = 14 (0xe), region = 110 }
 0x2d2   : > { %s1602_s26 = smov %s1596_s17 }
 0x2d7   :  { %639 = vsyncpa [#allocation3], 1 }
 0x2d8   :  { %641 = vsyncpa [#allocation3 + $0x1], 1 }
 0x2d9   :  { %642 = vsyncpa [#allocation6], 1 }
 0x2da   :  { %643 = vsyncpa [#allocation4], 1 }
 0x2db   :  { %645 = vsyncpa [#allocation4 + $0x1], 1 }
 0x2dc   :  { %646 = vsyncpa [#allocation10], 1 }
 0x2dd   :  { %648 = vsyncpa [#allocation10 + $0x1], 1 }

</bundles_post_ra>
